<compile_context>
chip_gen: v5e
topology: v5e:2x2
jax: 0.10.0
libtpu: 0.0.40
codegen_flags: <defaults>
</compile_context>

<pallas_src>
import functools
import math

import jax
import jax.numpy as jnp
from jax.experimental import pallas as pl
from jax.experimental.pallas import tpu as pltpu


# ----------------------------------------------------------------------------
# Hardware-aware knobs
# ----------------------------------------------------------------------------
@functools.lru_cache(maxsize=None)
def _vmem_limit_bytes():
    """Generation-aware VMEM budget: big tiles on v5e/v6e, safe headroom on v7x."""
    cap = 64 * 1024 * 1024
    try:
        info = pltpu.get_tpu_info()
        for attr in ("vmem_capacity_bytes", "vmem_size_bytes", "vmem_bytes"):
            val = getattr(info, attr, None)
            if val:
                cap = int(val)
                break
    except Exception:
        pass
    return int(max(32 * 1024 * 1024,
                   min(cap - 16 * 1024 * 1024, 100 * 1024 * 1024)))


def _compiler_params(semantics):
    return pltpu.CompilerParams(dimension_semantics=semantics,
                                vmem_limit_bytes=_vmem_limit_bytes())


def _probe_kernel(x_ref, o_ref):
    o_ref[...] = x_ref[...] + 1.0


_BUFFERED_OK = None


def _buffered_weights_ok():
    """Probe once whether pipeline_mode=pl.Buffered(1) works on this JAX/TPU
    (single-buffer grid-invariant weights -> halves resident weight VMEM)."""
    global _BUFFERED_OK
    if _BUFFERED_OK is None:
        try:
            spec = pl.BlockSpec((8, 128), lambda i: (0, 0),
                                pipeline_mode=pl.Buffered(1))
            out = pl.pallas_call(
                _probe_kernel,
                out_shape=jax.ShapeDtypeStruct((8, 128), jnp.float32),
                grid=(1,),
                in_specs=[spec],
                out_specs=pl.BlockSpec((8, 128), lambda i: (0, 0)),
            )(jnp.zeros((8, 128), jnp.float32))
            _BUFFERED_OK = bool(jnp.allclose(out, 1.0))
        except Exception:
            _BUFFERED_OK = False
    return _BUFFERED_OK


def _weight_spec(block_shape, index_map):
    """BlockSpec for grid-invariant weights (constant index_map)."""
    if _buffered_weights_ok():
        return pl.BlockSpec(block_shape, index_map, pipeline_mode=pl.Buffered(1))
    return pl.BlockSpec(block_shape, index_map)


# ----------------------------------------------------------------------------
# Tiling / small helpers
# ----------------------------------------------------------------------------
def _round_up(x, mult):
    return x + ((-x) % mult)


def _row_plan(m):
    """(row_tile, padded_rows): full-extent block for small M, else 256-row tiles."""
    if m <= 512:
        return m, m
    tm = 256
    return tm, _round_up(m, tm)


def _col_plan(n):
    if n <= 512:
        return n, n
    tn = 512
    return tn, _round_up(n, tn)


def _pad_axis(x, target, axis):
    pad = target - x.shape[axis]
    if pad <= 0:
        return x
    widths = [(0, 0)] * x.ndim
    widths[axis] = (0, pad)
    return jnp.pad(x, widths)


def _to_bf16(x):
    return x if x.dtype == jnp.bfloat16 else x.astype(jnp.bfloat16)


def _apply_activation(y, activation):
    if activation == "relu":
        return jnp.maximum(y, 0.0)
    if activation == "gelu":   # tanh ("new GELU") approximation, as in nanoGPT
        return 0.5 * y * (1.0 + jnp.tanh(0.7978845608028654 *
                                         (y + 0.044715 * y * y * y)))
    return y


def _layernorm(x, g, b, eps):
    mu = jnp.mean(x, axis=-1, keepdims=True)
    var = jnp.mean(jnp.square(x - mu), axis=-1, keepdims=True)
    return ((x - mu) * jax.lax.rsqrt(var + eps) * g.astype(jnp.float32)
            + b.astype(jnp.float32))


# ----------------------------------------------------------------------------
# Pallas kernels
# ----------------------------------------------------------------------------
def _linear_acc_kernel(x_ref, w_ref, b_ref, o_ref, acc_ref, *, activation):
    @pl.when(pl.program_id(2) == 0)
    def _init():
        acc_ref[...] = jnp.zeros_like(acc_ref)

    acc_ref[...] += jnp.dot(x_ref[...], w_ref[...],
                            preferred_element_type=jnp.float32)

    @pl.when(pl.program_id(2) == pl.num_programs(2) - 1)
    def _finalize():
        y = acc_ref[...] + b_ref[...].astype(jnp.float32)
        o_ref[...] = _apply_activation(y, activation).astype(o_ref.dtype)


def fused_linear(x, w, b, activation=None, out_dtype=jnp.float32):
    """y = activation(x @ w + b); bf16 matmul, f32 VMEM accumulator, (M,N,K)
    tiled.  Awkward shapes are zero-padded to the tile (never 8-row tiles)."""
    m, k = x.shape
    n = w.shape[1]
    tm, mp = _row_plan(m)
    tn, np_ = _col_plan(n)
    tk, kp = _col_plan(k)
    x = _pad_axis(_pad_axis(_to_bf16(x), mp, 0), kp, 1)
    w = _pad_axis(_pad_axis(_to_bf16(w), kp, 0), np_, 1)
    b = _pad_axis(b, np_, 1)
    out = pl.pallas_call(
        functools.partial(_linear_acc_kernel, activation=activation),
        out_shape=jax.ShapeDtypeStruct((mp, np_), out_dtype),
        grid=(mp // tm, np_ // tn, kp // tk),
        in_specs=[
            pl.BlockSpec((tm, tk), lambda i, j, kk: (i, kk)),
            pl.BlockSpec((tk, tn), lambda i, j, kk: (kk, j)),
            pl.BlockSpec((1, tn), lambda i, j, kk: (0, j)),
        ],
        out_specs=pl.BlockSpec((tm, tn), lambda i, j, kk: (i, j)),
        scratch_shapes=[pltpu.VMEM((tm, tn), jnp.float32)],
        compiler_params=_compiler_params(("parallel", "parallel", "arbitrary")),
    )(x, w, b)
    return out[:m, :n]


def _ln_linear_kernel(x_ref, g_ref, be_ref, w_ref, b_ref, o_ref, *, eps, activation):
    x = x_ref[...].astype(jnp.float32)
    xn = _layernorm(x, g_ref[...], be_ref[...], eps)
    y = jnp.dot(xn.astype(jnp.bfloat16), w_ref[...],
                preferred_element_type=jnp.float32)
    y = y + b_ref[...].astype(jnp.float32)
    o_ref[...] = _apply_activation(y, activation).astype(o_ref.dtype)


def ln_linear(x, gamma, beta, w, b, activation=None, out_dtype=jnp.bfloat16, eps=1e-5):
    """Fused LayerNorm(x) @ w + b, row-tiled; LN stats in f32, matmul bf16."""
    m, d = x.shape
    n = w.shape[1]
    tm, mp = _row_plan(m)
    x = _pad_axis(_to_bf16(x), mp, 0)
    out = pl.pallas_call(
        functools.partial(_ln_linear_kernel, eps=eps, activation=activation),
        out_shape=jax.ShapeDtypeStruct((mp, n), out_dtype),
        grid=(mp // tm,),
        in_specs=[
            pl.BlockSpec((tm, d), lambda i: (i, 0)),
            _weight_spec((1, d), lambda i: (0, 0)),
            _weight_spec((1, d), lambda i: (0, 0)),
            _weight_spec((d, n), lambda i: (0, 0)),
            _weight_spec((1, n), lambda i: (0, 0)),
        ],
        out_specs=pl.BlockSpec((tm, n), lambda i: (i, 0)),
        compiler_params=_compiler_params(("parallel",)),
    )(x, gamma, beta, _to_bf16(w), b)
    return out[:m]


def _gpt_block_kernel(h_ref, ln1g_ref, ln1b_ref, wqkv_ref, bqkv_ref,
                      wproj_ref, bproj_ref, ln2g_ref, ln2b_ref,
                      wfc_ref, bfc_ref, wfcp_ref, bfcp_ref, o_ref,
                      *, n_head, head_dim, eps):
    nb, t, e = h_ref.shape
    scale = 1.0 / math.sqrt(head_dim)
    h = h_ref[...].astype(jnp.float32).reshape(nb * t, e)

    # --- LN1 + fused QKV projection ---
    xn = _layernorm(h, ln1g_ref[...], ln1b_ref[...], eps)
    qkv = jnp.dot(xn.astype(jnp.bfloat16), wqkv_ref[...],
                  preferred_element_type=jnp.float32)
    qkv = (qkv + bqkv_ref[...].astype(jnp.float32)).astype(jnp.bfloat16)
    qkv = qkv.reshape(nb, t, 3 * e)

    # --- causal MHA; output projection accumulated per head (no concatenate,
    #     per-head (T,T) tiles are consumed immediately) ---
    row = jax.lax.broadcasted_iota(jnp.int32, (t, t), 0)
    col = jax.lax.broadcasted_iota(jnp.int32, (t, t), 1)
    causal = (col <= row)[None]
    wproj = wproj_ref[...]
    y = jnp.zeros((nb * t, e), jnp.float32)
    for hh in range(n_head):
        lo = hh * head_dim
        q = qkv[:, :, lo:lo + head_dim]
        k = qkv[:, :, e + lo:e + lo + head_dim]
        v = qkv[:, :, 2 * e + lo:2 * e + lo + head_dim]
        q = (q.astype(jnp.float32) * scale).astype(jnp.bfloat16)  # fold 1/sqrt(hd)
        s = jnp.einsum("bqd,bkd->bqk", q, k, preferred_element_type=jnp.float32)
        s = jnp.where(causal, s, -1e30)
        s = s - jnp.max(s, axis=-1, keepdims=True)
        p = jnp.exp(s)                                             # softmax in f32
        p = p * pl.reciprocal(jnp.sum(p, axis=-1, keepdims=True), approx=True)
        att = jnp.einsum("bqk,bkd->bqd", p.astype(jnp.bfloat16), v,
                         preferred_element_type=jnp.float32)
        att = att.reshape(nb * t, head_dim).astype(jnp.bfloat16)
        y = y + jnp.dot(att, wproj[lo:lo + head_dim, :],
                        preferred_element_type=jnp.float32)
    h = h + y + bproj_ref[...].astype(jnp.float32)

    # --- LN2 + MLP (GELU) + residual ---
    xn2 = _layernorm(h, ln2g_ref[...], ln2b_ref[...], eps)
    a = jnp.dot(xn2.astype(jnp.bfloat16), wfc_ref[...],
                preferred_element_type=jnp.float32)
    a = _apply_activation(a + bfc_ref[...].astype(jnp.float32), "gelu")
    y2 = jnp.dot(a.astype(jnp.bfloat16), wfcp_ref[...],
                 preferred_element_type=jnp.float32)
    h = h + y2 + bfcp_ref[...].astype(jnp.float32)

    o_ref[...] = h.reshape(nb, t, e).astype(o_ref.dtype)


def _batch_tile(n, t):
    nb = max(1, min(n, 256 // max(t, 1)))
    while n % nb:
        nb -= 1
    return nb


def gpt_block(h, blk, n_head, head_dim, eps=1e-5):
    """Whole transformer block in ONE pallas_call per batch tile."""
    n, t, e = h.shape
    nb = _batch_tile(n, t)
    io_spec = pl.BlockSpec((nb, t, e), lambda i: (i, 0, 0))
    # TODO(synk): for N=1 inference on v7x a second (head / q-row) parallel grid
    # axis would let both TensorCores work; not done for the whole-block fusion.
    return pl.pallas_call(
        functools.partial(_gpt_block_kernel, n_head=n_head,
                          head_dim=head_dim, eps=eps),
        out_shape=jax.ShapeDtypeStruct((n, t, e), jnp.bfloat16),
        grid=(n // nb,),
        in_specs=[
            io_spec,
            _weight_spec((1, e), lambda i: (0, 0)),        # ln1 gamma
            _weight_spec((1, e), lambda i: (0, 0)),        # ln1 beta
            _weight_spec((e, 3 * e), lambda i: (0, 0)),    # qkv weight
            _weight_spec((1, 3 * e), lambda i: (0, 0)),    # qkv bias
            _weight_spec((e, e), lambda i: (0, 0)),        # out-proj weight
            _weight_spec((1, e), lambda i: (0, 0)),        # out-proj bias
            _weight_spec((1, e), lambda i: (0, 0)),        # ln2 gamma
            _weight_spec((1, e), lambda i: (0, 0)),        # ln2 beta
            _weight_spec((e, 4 * e), lambda i: (0, 0)),    # fc weight
            _weight_spec((1, 4 * e), lambda i: (0, 0)),    # fc bias
            _weight_spec((4 * e, e), lambda i: (0, 0)),    # proj-back weight
            _weight_spec((1, e), lambda i: (0, 0)),        # proj-back bias
        ],
        out_specs=io_spec,
        compiler_params=_compiler_params(("parallel",)),
    )(_to_bf16(h), blk["ln1_g"], blk["ln1_b"], blk["attn_w"], blk["attn_b"],
      blk["proj_w"], blk["proj_b"], blk["ln2_g"], blk["ln2_b"],
      blk["fc_w"], blk["fc_b"], blk["fcp_w"], blk["fcp_b"])


def _mlp_kernel(*refs, activations, final_scale):
    x_ref = refs[0]
    o_ref = refs[-1]
    wb = refs[1:-1]
    h = x_ref[...]
    for li, act in enumerate(activations):
        w = wb[2 * li][...]
        b = wb[2 * li + 1][...].astype(jnp.float32)
        y = jnp.dot(h.astype(jnp.bfloat16), w,
                    preferred_element_type=jnp.float32) + b
        h = _apply_activation(y, act)
    if final_scale != 1.0:
        h = h * final_scale
    o_ref[...] = h.astype(o_ref.dtype)


def fused_mlp(x, layers, out_dtype=jnp.float32, final_scale=1.0):
    """Multi-layer (matmul + bias + activation) MLP fused into one row-tiled
    kernel; intermediates never leave VMEM.  layers: [(w (k,n), b (1,n), act)]."""
    m, k0 = x.shape
    tm, mp = _row_plan(m)
    x = _pad_axis(_to_bf16(x), mp, 0)
    activations = tuple(act for _, _, act in layers)
    operands = [x]
    in_specs = [pl.BlockSpec((tm, k0), lambda i: (i, 0))]
    for w, b, _ in layers:
        kw, nw = w.shape
        operands.append(_to_bf16(w))
        operands.append(b)
        in_specs.append(_weight_spec((kw, nw), lambda i: (0, 0)))
        in_specs.append(_weight_spec((1, nw), lambda i: (0, 0)))
    n_out = layers[-1][0].shape[1]
    out = pl.pallas_call(
        functools.partial(_mlp_kernel, activations=activations,
                          final_scale=final_scale),
        out_shape=jax.ShapeDtypeStruct((mp, n_out), out_dtype),
        grid=(mp // tm,),
        in_specs=in_specs,
        out_specs=pl.BlockSpec((tm, n_out), lambda i: (i, 0)),
        compiler_params=_compiler_params(("parallel",)),
    )(*operands)
    return out[:m]


def _offset_select_kernel(centers_ref, h_ref, w_ref, b_ref, o_ref, *,
                          n_groups, n_embed):
    i = pl.program_id(0)
    g = pl.program_id(1)
    c = centers_ref[i * n_groups + g]
    h_row = h_ref[pl.ds(i, 1), :]                                  # (1, H) bf16
    y = jnp.dot(h_row, w_ref[0, 0], preferred_element_type=jnp.float32)
    y = y + b_ref[pl.ds(g * n_embed + c, 1), :]

    @pl.when(g == 0)
    def _init():
        o_ref[pl.ds(i, 1), :] = y

    @pl.when(g > 0)
    def _acc():
        o_ref[pl.ds(i, 1), :] = o_ref[pl.ds(i, 1), :] + y


def offset_select(h_off, centers_flat, w_sel, b_sel, n_groups, n_embed):
    """Offset-head final layer applied ONLY to the sampled code per (row, group).
    The index_map reads the scalar-prefetched centers and DMAs just the sampled
    (H, Zp) weight slab; the output is the per-row sum over groups."""
    m, hdim = h_off.shape
    zp = w_sel.shape[-1]
    grid_spec = pltpu.PrefetchScalarGridSpec(
        num_scalar_prefetch=1,
        grid=(m, n_groups),
        in_specs=[
            pl.BlockSpec((m, hdim), lambda i, g, c: (0, 0)),             # resident
            pl.BlockSpec((1, 1, hdim, zp),
                         lambda i, g, c: (g, c[i * n_groups + g], 0, 0)),
            pl.BlockSpec((n_groups * n_embed, zp), lambda i, g, c: (0, 0)),
        ],
        out_specs=pl.BlockSpec((m, zp), lambda i, g, c: (0, 0)),         # resident acc
    )
    return pl.pallas_call(
        functools.partial(_offset_select_kernel, n_groups=n_groups,
                          n_embed=n_embed),
        out_shape=jax.ShapeDtypeStruct((m, zp), jnp.float32),
        grid_spec=grid_spec,
        compiler_params=_compiler_params(("arbitrary", "arbitrary")),
    )(centers_flat, h_off, w_sel, b_sel)


def offset_select_fallback(h_off, centers_flat, w_sel, b_sel, n_groups, n_embed):
    """Plain-JAX gather + batched matvec fallback (same math as offset_select)."""
    m = h_off.shape[0]
    c = centers_flat.reshape(m, n_groups)
    w_g = w_sel[jnp.arange(n_groups)[None, :], c]                  # (m, G, H, Zp)
    b_g = b_sel.reshape(n_groups, n_embed, -1)[jnp.arange(n_groups)[None, :], c]
    off = jnp.einsum("mh,mghz->mgz", h_off.astype(jnp.float32),
                     w_g.astype(jnp.float32)) + b_g
    return off.sum(axis=1)


# ----------------------------------------------------------------------------
# Glue (plain JAX): parameter setup, reshapes, orchestration
# ----------------------------------------------------------------------------
def repeat_start_to_length(x, length, axis=1):
    pad = length - x.shape[axis]
    if pad <= 0:
        return x
    first = jax.lax.index_in_dim(x, 0, axis=axis, keepdims=True)
    reps = [1] * x.ndim
    reps[axis] = pad
    return jnp.concatenate([jnp.tile(first, reps), x], axis=axis)


def _dense(key, fan_in, fan_out, w_dtype=jnp.bfloat16):
    w = (jax.random.normal(key, (fan_in, fan_out), jnp.float32) * 0.02).astype(w_dtype)
    b = jnp.zeros((1, fan_out), jnp.float32)
    return w, b


class _KeyIter:
    def __init__(self, key):
        self._key = key

    def __call__(self):
        self._key, k = jax.random.split(self._key)
        return k


def gpt_forward(p, x):
    """minGPT-style transformer: linear token embed + pos embed + fused blocks + LN/head."""
    n, t, _ = x.shape
    e = p["n_embd"]
    nh = p["n_head"]
    hd = e // nh
    m = n * t
    h = fused_linear(x.reshape(m, -1), p["wte_w"], p["wte_b"],
                     out_dtype=jnp.bfloat16)
    h = h.reshape(n, t, e) + p["wpe"][:t][None]
    for blk in p["blocks"]:
        h = gpt_block(h, blk, nh, hd)
    out = ln_linear(h.reshape(m, e), p["lnf_g"], p["lnf_b"],
                    p["head_w"], p["head_b"], out_dtype=jnp.bfloat16)
    return out.reshape(n, t, -1)


class BehaviorTransformerPallas:
    def __init__(self, obs_dim, act_dim, goal_dim, views, vqvae_latent_dim,
                 vqvae_n_embed, vqvae_groups, n_layer, n_head, n_embd,
                 obs_window_size, act_window_size, act_scale=1.0, key=None):
        self.obs_dim = obs_dim * views
        self.goal_dim = goal_dim * views
        self.A = act_dim
        self.W = act_window_size
        self.obs_window_size = obs_window_size
        self.G = vqvae_groups
        self.C = vqvae_n_embed
        self.D = vqvae_latent_dim
        self.act_scale = act_scale
        self.cbet_method = "unconditional" if goal_dim <= 0 else "stack"
        nk = _KeyIter(key)

        input_dim = self.obs_dim + self.goal_dim
        output_dim = n_embd          # GPT output head dim (= n_embd)
        block_size = obs_window_size + act_window_size

        # --- GPT params (matmul weights bf16, biases / LN params f32) ---
        gp = {"n_head": n_head, "n_embd": n_embd}
        gp["wte_w"], gp["wte_b"] = _dense(nk(), input_dim, n_embd)
        gp["wpe"] = (jax.random.normal(nk(), (block_size, n_embd), jnp.float32)
                     * 0.02).astype(jnp.bfloat16)
        blocks = []
        for _ in range(n_layer):
            blk = {}
            blk["ln1_g"] = jnp.ones((1, n_embd), jnp.float32)
            blk["ln1_b"] = jnp.zeros((1, n_embd), jnp.float32)
            blk["attn_w"], blk["attn_b"] = _dense(nk(), n_embd, 3 * n_embd)
            blk["proj_w"], blk["proj_b"] = _dense(nk(), n_embd, n_embd)
            blk["ln2_g"] = jnp.ones((1, n_embd), jnp.float32)
            blk["ln2_b"] = jnp.zeros((1, n_embd), jnp.float32)
            blk["fc_w"], blk["fc_b"] = _dense(nk(), n_embd, 4 * n_embd)
            blk["fcp_w"], blk["fcp_b"] = _dense(nk(), 4 * n_embd, n_embd)
            blocks.append(blk)
        gp["blocks"] = blocks
        gp["lnf_g"] = jnp.ones((1, n_embd), jnp.float32)
        gp["lnf_b"] = jnp.zeros((1, n_embd), jnp.float32)
        gp["head_w"], gp["head_b"] = _dense(nk(), n_embd, output_dim)
        self.gpt_params = gp

        # --- cbet heads + VQ-VAE codebook / decoder ---
        p = {}
        gc = self.G * self.C
        gc_pad = _round_up(gc, 128)          # lane-dense bin-head output
        z = self.W * self.A
        z_pad = _round_up(z, 128)            # lane-dense offset / decoder output

        p["bin_w0"], p["bin_b0"] = _dense(nk(), output_dim, 1024)
        p["bin_w1"], p["bin_b1"] = _dense(nk(), 1024, 1024)
        w2, b2 = _dense(nk(), 1024, gc)
        p["bin_w2"] = _pad_axis(w2, gc_pad, 1)
        p["bin_b2"] = _pad_axis(b2, gc_pad, 1)

        p["off_w0"], p["off_b0"] = _dense(nk(), output_dim, 1024)
        p["off_w1"], p["off_b1"] = _dense(nk(), 1024, 1024)
        ow2, ob2 = _dense(nk(), 1024, gc * z)        # 1024 -> G*C*W*A
        # Rearranged for the scalar-prefetch select kernel:
        #   (1024, G*C*Z) -> (G, C, 1024, Zp) bf16 weights, (G*C, Zp) f32 bias.
        ow2 = jnp.transpose(ow2.reshape(1024, self.G, self.C, z), (1, 2, 0, 3))
        p["off_w2_sel"] = _pad_axis(ow2, z_pad, 3).astype(jnp.bfloat16)
        p["off_b2_sel"] = _pad_axis(ob2.reshape(gc, z), z_pad, 1)

        p["codebook"] = jax.random.normal(nk(), (self.G, self.C, self.D),
                                          jnp.float32) * 0.1
        p["dec_w0"], p["dec_b0"] = _dense(nk(), self.D, 128)
        dw1, db1 = _dense(nk(), 128, z)
        p["dec_w1"] = _pad_axis(dw1, z_pad, 1)
        p["dec_b1"] = _pad_axis(db1, z_pad, 1)
        self.params = p

    def forward(self, obs_seq, goal_seq=None, action_seq=None, key=None):
        # TODO(synk): training-time VQ-VAE fitting (_maybe_fit_vq) and the loss
        # branch (_calc_loss: vqvae.get_code + FocalLoss + L1) are host-side
        # optimizer/loss logic, not translated; inference returns (pred, None, {}).
        if obs_seq.shape[1] < self.obs_window_size:
            obs_seq = repeat_start_to_length(obs_seq, self.obs_window_size, axis=1)
        if self.cbet_method == "unconditional":
            gpt_input = obs_seq
        else:  # "stack"
            if goal_seq.shape[1] < self.obs_window_size:
                goal_seq = repeat_start_to_length(goal_seq, self.obs_window_size, axis=1)
            gpt_input = jnp.concatenate([goal_seq, obs_seq], axis=-1)

        gpt_output = gpt_forward(self.gpt_params, gpt_input)        # (N, T, E) bf16
        n, t, _ = gpt_output.shape
        m = n * t
        flat = gpt_output.reshape(m, -1)
        p = self.params
        gc = self.G * self.C
        z = self.W * self.A

        # bin head: 3-layer MLP fused into one kernel, lane-dense (padded) output
        cbet_logits = fused_mlp(
            flat,
            [(p["bin_w0"], p["bin_b0"], "relu"),
             (p["bin_w1"], p["bin_b1"], "relu"),
             (p["bin_w2"], p["bin_b2"], None)],
            out_dtype=jnp.float32)[:, :gc].reshape(n, t, self.G, self.C)

        # torch.multinomial(softmax(logits)) == categorical sampling on logits
        sampled_centers = jax.random.categorical(key, cbet_logits, axis=-1)   # (N,T,G)
        centers_flat = sampled_centers.reshape(-1).astype(jnp.int32)          # (m*G,)

        # offset head: fused hidden layers; the final linear touches only the
        # sampled (1024, W*A) weight slab per (row, group) via scalar prefetch.
        h_off = fused_mlp(
            flat,
            [(p["off_w0"], p["off_b0"], "relu"),
             (p["off_w1"], p["off_b1"], "relu")],
            out_dtype=jnp.bfloat16)                                  # (m, 1024)
        try:
            off = offset_select(h_off, centers_flat, p["off_w2_sel"],
                                p["off_b2_sel"], self.G, self.C)
        except Exception:
            off = offset_select_fallback(h_off, centers_flat, p["off_w2_sel"],
                                         p["off_b2_sel"], self.G, self.C)
        sampled_offsets = off[:, :z].reshape(n, t, self.W, self.A)

        # draw_code_forward: residual-VQ lookup summed over groups, then decoder MLP
        onehot = jax.nn.one_hot(sampled_centers, self.C, dtype=jnp.float32)
        latent = jnp.einsum("ntgc,gcd->ntd", onehot, p["codebook"])
        decoded = fused_mlp(
            latent.reshape(m, self.D),
            [(p["dec_w0"], p["dec_b0"], "relu"),
             (p["dec_w1"], p["dec_b1"], None)],
            out_dtype=jnp.float32, final_scale=self.act_scale)[:, :z]
        decoded_action = decoded.reshape(n, t, self.W, self.A)

        predicted_action = decoded_action + sampled_offsets
        return predicted_action, None, {}


if __name__ == "__main__":
    key = jax.random.PRNGKey(0)
    k_param, k_obs, k_sample = jax.random.split(key, 3)

    obs_dim, views, goal_dim, act_dim = 6, 1, 0, 3
    model = BehaviorTransformerPallas(
        obs_dim=obs_dim, act_dim=act_dim, goal_dim=goal_dim, views=views,
        vqvae_latent_dim=8, vqvae_n_embed=16, vqvae_groups=2,
        n_layer=2, n_head=2, n_embd=32,
        obs_window_size=5, act_window_size=3, act_scale=1.0, key=k_param)

    # obs_seq shorter than obs_window_size exercises repeat_start_to_length
    obs_seq = jax.random.normal(k_obs, (2, 3, obs_dim * views), jnp.float32)

    pred, loss, loss_dict = model.forward(obs_seq, goal_seq=None,
                                          action_seq=None, key=k_sample)
    pred = jax.block_until_ready(pred)
    assert pred.shape == (2, 5, 3, 3), pred.shape
    assert loss is None and loss_dict == {}
    print("KERNEL_OK")
</pallas_src>

<mosaic_0001>
module attributes {stable_mosaic.version = 11 : i64} {
  func.func @_linear_acc_kernel(%arg0: i32, %arg1: i32, %arg2: i32, %arg3: memref<10x6xbf16, #tpu.memory_space<vmem>>, %arg4: memref<6x32xbf16, #tpu.memory_space<vmem>>, %arg5: memref<1x32xf32, #tpu.memory_space<vmem>>, %arg6: memref<10x32xbf16, #tpu.memory_space<vmem>>, %arg7: memref<10x32xf32, #tpu.memory_space<vmem>>) attributes {dimension_semantics = [#tpu.dimension_semantics<parallel>, #tpu.dimension_semantics<parallel>, #tpu.dimension_semantics<arbitrary>], iteration_bounds = array<i64: 1, 1, 1>, scalar_prefetch = 0 : i64, scratch_operands = 1 : i64, tpu.core_type = #tpu.core_type<tc>, window_params = [{transform_indices = @transform_0, window_bounds = array<i64: 10, 6>}, {transform_indices = @transform_1, window_bounds = array<i64: 6, 32>}, {transform_indices = @transform_2, window_bounds = array<i64: 1, 32>}, {transform_indices = @transform_3, window_bounds = array<i64: 10, 32>}]} {
    %c0_i32 = arith.constant 0 : i32
    %0 = arith.cmpi eq, %arg2, %c0_i32 : i32
    %1 = arith.extui %0 : i1 to i32
    %c0_i32_0 = arith.constant 0 : i32
    %2 = arith.cmpi ne, %1, %c0_i32_0 : i32
    scf.if %2 {
      %cst_10 = arith.constant 0.000000e+00 : f32
      %12 = vector.broadcast %cst_10 : f32 to vector<10x32xf32>
      %c0_11 = arith.constant 0 : index
      %c0_12 = arith.constant 0 : index
      %13 = vector.load %arg7[%c0_11, %c0_12] : memref<10x32xf32, #tpu.memory_space<vmem>>, vector<10x32xf32>
      tpu.vector_store %arg7[%c0_11, %c0_12], %12 {strides = array<i32>} : memref<10x32xf32, #tpu.memory_space<vmem>>, vector<10x32xf32>,
    } else {
    }
    %c0 = arith.constant 0 : index
    %c0_1 = arith.constant 0 : index
    %3 = vector.load %arg7[%c0, %c0_1] : memref<10x32xf32, #tpu.memory_space<vmem>>, vector<10x32xf32>
    %c0_2 = arith.constant 0 : index
    %c0_3 = arith.constant 0 : index
    %4 = vector.load %arg3[%c0_2, %c0_3] : memref<10x6xbf16, #tpu.memory_space<vmem>>, vector<10x6xbf16>
    %c0_4 = arith.constant 0 : index
    %c0_5 = arith.constant 0 : index
    %5 = vector.load %arg4[%c0_4, %c0_5] : memref<6x32xbf16, #tpu.memory_space<vmem>>, vector<6x32xbf16>
    %cst = arith.constant dense<0.000000e+00> : vector<10x32xf32>
    %6 = tpu.matmul %4, %5, %cst {dimension_numbers = #tpu.dot_dimension_numbers<[1], [0], [0], [1], [0, 0, 1, 1], [], []>} : vector<10x6xbf16>, vector<6x32xbf16>, vector<10x32xf32> -> vector<10x32xf32>
    %7 = arith.addf %3, %6 : vector<10x32xf32>
    %c0_6 = arith.constant 0 : index
    %c0_7 = arith.constant 0 : index
    %8 = vector.load %arg7[%c0_6, %c0_7] : memref<10x32xf32, #tpu.memory_space<vmem>>, vector<10x32xf32>
    tpu.vector_store %arg7[%c0_6, %c0_7], %7 {strides = array<i32>} : memref<10x32xf32, #tpu.memory_space<vmem>>, vector<10x32xf32>,
    %c0_i32_8 = arith.constant 0 : i32
    %9 = arith.cmpi eq, %arg2, %c0_i32_8 : i32
    %10 = arith.extui %9 : i1 to i32
    %c0_i32_9 = arith.constant 0 : i32
    %11 = arith.cmpi ne, %10, %c0_i32_9 : i32
    scf.if %11 {
      %c0_10 = arith.constant 0 : index
      %c0_11 = arith.constant 0 : index
      %12 = vector.load %arg7[%c0_10, %c0_11] : memref<10x32xf32, #tpu.memory_space<vmem>>, vector<10x32xf32>
      %c0_12 = arith.constant 0 : index
      %c0_13 = arith.constant 0 : index
      %13 = vector.load %arg5[%c0_12, %c0_13] : memref<1x32xf32, #tpu.memory_space<vmem>>, vector<1x32xf32>
      %14 = vector.broadcast %13 : vector<1x32xf32> to vector<10x32xf32>
      %15 = arith.addf %12, %14 : vector<10x32xf32>
      %16 = arith.truncf %15 : vector<10x32xf32> to vector<10x32xbf16>
      %c0_14 = arith.constant 0 : index
      %c0_15 = arith.constant 0 : index
      %17 = vector.load %arg6[%c0_14, %c0_15] : memref<10x32xbf16, #tpu.memory_space<vmem>>, vector<10x32xbf16>
      tpu.vector_store %arg6[%c0_14, %c0_15], %16 {strides = array<i32>} : memref<10x32xbf16, #tpu.memory_space<vmem>>, vector<10x32xbf16>,
    } else {
    }
    return
  }
  func.func @transform_0(%arg0: i32, %arg1: i32, %arg2: i32) -> (i32, i32) {
    %c0_i32 = arith.constant 0 : i32
    return %arg0, %arg2 : i32, i32
  }
  func.func @transform_1(%arg0: i32, %arg1: i32, %arg2: i32) -> (i32, i32) {
    %c0_i32 = arith.constant 0 : i32
    return %arg2, %arg1 : i32, i32
  }
  func.func @transform_2(%arg0: i32, %arg1: i32, %arg2: i32) -> (i32, i32) {
    %c0_i32 = arith.constant 0 : i32
    %c0_i32_0 = arith.constant 0 : i32
    return %c0_i32, %arg1 : i32, i32
  }
  func.func @transform_3(%arg0: i32, %arg1: i32, %arg2: i32) -> (i32, i32) {
    %c0_i32 = arith.constant 0 : i32
    return %arg0, %arg1 : i32, i32
  }
}

</mosaic_0001>

<bundles_post_ra>
// kernel: tpu_custom_call.1
= control target key start
LH: loop header
LB: loop body
LE: loop exit
PB: predicated region body
PF: predicated region fallthrough
CT: control target
= control target key end

     0   :  { %vm38_vm0 = vcmask 1042432   ;;  %vm20_vm1 = vcmask 261120   ;;  %vm34_vm2 = vcmask 48128   ;;  %v134_v5 = vmov 0.0   ;;  %s173_s0 = inlined_call_operand.vmem [shape: bf16[10,6], index: 0, kind: input, shape index: {}]   ;;  %s174_s1 = inlined_call_operand.vmem [shape: bf16[6,32], index: 1, kind: input, shape index: {}]   ;;  %s175_s2 = inlined_call_operand.vmem [shape: f32[1,32], index: 2, kind: input, shape index: {}]   ;;  %s176_s3 = inlined_call_operand.hbm [shape: bf16[10,32], index: 3, kind: output, shape index: {}]  }
   0x1   :  { %v28_v0 = vld [vmem:[%s174_s1] sm:$0x7]  ;;  %v102_v3 = vld [vmem:[%s173_s0] sm:$0x10]  ;;  %21 = vst.msk [vmem:[#allocation2] sm:$0xff] %vm20_vm1, %v134_v5 }
   0x2   :  { %v99_v1 = vld [vmem:[%s173_s0] sm:$0xf]  ;;  %v40_v2 = vsel %vm38_vm0, %v28_v0, 0 }
   0x3   :  { %49 = vmatpush.bf16.msra.mxu0 %v40_v2  ;;  %v100_v4 = vor.u32 %v102_v3, %v99_v1 }
   0x4   :  { %8 = vsyncpa [#allocation4], 0  ;;  %vm22_vm3 = vcmask 254976   ;;  %v107_v10 = vld [vmem:[%s175_s2] ss:$0 sm:$0xff]  ;;  %vm75_vm4 = vcmask 257024  }
   0x5   :  { %23 = vst.msk [vmem:[#allocation2 + $0x8] sm:$0x3] %vm22_vm3, %v134_v5  ;;  %s135_s0 = smov [#allocation3]   ;;  %s85_s22 = sshll.u32 %s176_s3, 4  ;;  %vm77_vm5 = vcmask 253952   ;;  %s86_s22 = int_to_ptr.hbm [resolvable:$true] %s85_s22 }
   0x6   :  { %101 = vmatmul.msk.bf16.vlgmr.msra.gmra.mxu0 %vm34_vm2, %v100_v4  ;;  %s83_s19 = sshll.u32 %s135_s0, 4  ;;  %s136_s2 = smov 64   ;;  %s84_s19 = int_to_ptr.vmem [resolvable:$true] %s83_s19 }
   0x7   :  { %s137_s23 = smov 4  }
   0x8   :  { %v24_v6 = vld [vmem:[#allocation2] sm:$0xff] }
   0xc   :  { %v25_v9 = vld [vmem:[#allocation2 + $0x8] sm:$0x3] }
  0x83   :  { %v51_v7 = vpop.f32.mrf.mxu0 }
  0x84   :  { %v56_v8 = vadd.f32 %v51_v7, %v24_v6 }
  0x86   :  { %59 = vst.msk [vmem:[#allocation2] sm:$0xff] %vm20_vm1, %v56_v8 }
  0x8b   :  { %v53_v11 = vpop.f32.mrf.mxu0 }
  0x8c   :  { %v57_v12 = vadd.f32 %v53_v11, %v25_v9 }
  0x8d   :  { %v65_v13 = vld [vmem:[#allocation2] sm:$0xff] }
  0x8e   :  { %61 = vst.msk [vmem:[#allocation2 + $0x8] sm:$0x3] %vm22_vm3, %v57_v12  ;;  %v71_v14 = vadd.f32 %v107_v10, %v65_v13 }
  0x90   :  { %v73_v15 = vpack.c.bf16 %v71_v14, %v71_v14 }
  0x92   :  { %76 = vst.msk [vmem:[#allocation3] sm:$0xf] %vm75_vm4, %v73_v15 }
  0x95   :  { %v66_v16 = vld [vmem:[#allocation2 + $0x8] sm:$0x3] }
  0x96   :  { %v72_v17 = vadd.f32 %v107_v10, %v66_v16 }
  0x98   :  { %v74_v18 = vpack.c.bf16 %v72_v17, %v72_v17 }
  0x9a   :  { %78 = vst.msk [vmem:[#allocation3 + $0x4] sm:$0x1] %vm77_vm5, %v74_v18 }
  0x9b   :  { %91 = dma.vmem_to_hbm [thread:$0]  %s84_s19, 128, %s86_s22, [#allocation4], %s136_s2, %s136_s2, %s137_s23  }
  0x9c   :  { %132 = dma.done.wait [#allocation4], 128  }
  0x9d   :  { %133 = vsyncadd [#allocation4], 4294967168 }
  0x9e   :  { %96 = vsyncpa [#allocation4], 1 }

</bundles_post_ra>
